<compile_context>
chip_gen: v7x
topology: tpu7x:2x2x1
jax: 0.10.0
libtpu: 0.0.40
codegen_flags: <defaults>
</compile_context>

<pallas_src>
import math
from functools import partial

import jax
import jax.numpy as jnp
from jax.experimental import pallas as pl
from jax.experimental.pallas import tpu as pltpu

LANE = 128
SUBLANE = 8


def _round_up(n, m):
    return ((n + m - 1) // m) * m


# ----------------------------- Pallas kernel ------------------------------ #

def _netg_kernel(x_ref, w1_ref, b1_ref, w2_ref, b2_ref, out_ref, *, apply_softplus):
    """Fused: softplus?(relu(x @ W1 + b1) @ W2 + b2).  All f32, lane-dense out."""
    x = x_ref[...]
    h = jnp.dot(x, w1_ref[...], preferred_element_type=jnp.float32) + b1_ref[...]
    h = jnp.maximum(h, 0.0)
    z = jnp.dot(h, w2_ref[...], preferred_element_type=jnp.float32) + b2_ref[...]
    if apply_softplus:
        # Matches torch.nn.functional.softplus (beta=1, threshold=20).
        z = jnp.where(z > 20.0, z, jnp.log1p(jnp.exp(jnp.minimum(z, 20.0))))
    out_ref[...] = z


# --------------------------- parameter preparation ------------------------- #

def conv5x5_to_matrix(w5, s):
    """Dense (s*s, s*s) matrix equivalent of Conv2d(1,1,5,padding=2) weights.

    out_flat = in_flat @ W_conv   (cross-correlation, 'same' padding).
    """
    iy = jnp.arange(s)[:, None, None, None]
    ix = jnp.arange(s)[None, :, None, None]
    oy = jnp.arange(s)[None, None, :, None]
    ox = jnp.arange(s)[None, None, None, :]
    di = iy - oy + 2
    dj = ix - ox + 2
    valid = (di >= 0) & (di < 5) & (dj >= 0) & (dj < 5)
    vals = w5[jnp.clip(di, 0, 4), jnp.clip(dj, 0, 4)]
    return jnp.where(valid, vals, 0.0).reshape(s * s, s * s)


def prepare_params(params, L1, L2, K, smooth_output):
    """One-time fold/transposition/padding of torch-layout weights (hoisted
    out of the per-call forward path).

    W1 keeps its natural (L1, Kp) shape (only the output/K lanes are padded);
    x is therefore NOT padded along L1 at call time.
    """
    Kp, L2p = _round_up(K, LANE), _round_up(L2, LANE)

    w1_t = params["w1"].T.astype(jnp.float32)            # (L1, K)
    b1 = params["b1"].astype(jnp.float32)                 # (K,)
    w2_t = params["w2"].T.astype(jnp.float32)             # (K, L2)
    b2 = params["b2"].astype(jnp.float32)                  # (L2,)

    if smooth_output:
        s = int(math.isqrt(L2))
        assert s * s == L2, "L2 must be a perfect square when smooth_output"
        w_conv = conv5x5_to_matrix(params["sml_w"].astype(jnp.float32), s)  # (L2, L2)
        w2_t = w2_t @ w_conv
        b2 = b2 @ w_conv + params["sml_b"][0]

    w1p = jnp.zeros((L1, Kp), jnp.float32).at[:, :K].set(w1_t)
    b1p = jnp.zeros((1, Kp), jnp.float32).at[0, :K].set(b1)
    w2p = jnp.zeros((Kp, L2p), jnp.float32).at[:K, :L2].set(w2_t)
    b2p = jnp.zeros((1, L2p), jnp.float32).at[0, :L2].set(b2)

    return {
        "w1": w1p, "b1": b1p, "w2": w2p, "b2": b2p,
        "L1": L1, "L2": L2, "smooth_output": smooth_output,
    }


# ------------------------------ forward wrapper ----------------------------- #

@partial(jax.jit, static_argnames=("L1", "L2", "smooth_output", "tb"))
def _forward_impl(x, w1, b1, w2, b2, *, L1, L2, smooth_output, tb):
    B = x.shape[0]
    Kp = w1.shape[1]
    L2p = w2.shape[1]

    # Batch tile: sublane-aligned, big enough to amortize per-step overhead,
    # capped so the grid has >=2 blocks when the batch allows (lets "parallel"
    # shard across both TensorCores on v7x; harmless elsewhere).
    TB = min(tb, _round_up(B, SUBLANE))
    if B > 2 * SUBLANE:
        TB = min(TB, _round_up(pl.cdiv(B, 2), SUBLANE))
    TB = max(TB, SUBLANE)
    grid = (pl.cdiv(B, TB),)

    kernel = partial(_netg_kernel, apply_softplus=smooth_output)

    cost = pl.CostEstimate(
        flops=2 * B * (L1 * Kp + Kp * L2p),
        transcendentals=(2 * B * L2p) if smooth_output else 0,
        bytes_accessed=4 * (B * L1 + B * L2p + L1 * Kp + Kp * L2p + Kp + L2p),
    )

    out = pl.pallas_call(
        kernel,
        out_shape=jax.ShapeDtypeStruct((B, L2p), jnp.float32),
        grid=grid,
        in_specs=[
            pl.BlockSpec((TB, L1), lambda i: (i, 0)),     # un-padded activations
            pl.BlockSpec((L1, Kp), lambda i: (0, 0)),     # W1 (resident)
            pl.BlockSpec((1, Kp), lambda i: (0, 0)),      # b1
            pl.BlockSpec((Kp, L2p), lambda i: (0, 0)),    # folded W2'
            pl.BlockSpec((1, L2p), lambda i: (0, 0)),     # folded b2'
        ],
        out_specs=pl.BlockSpec((TB, L2p), lambda i: (i, 0)),  # lane-dense output
        compiler_params=pltpu.CompilerParams(
            dimension_semantics=("parallel",),            # megacore shard on v7x
            vmem_limit_bytes=32 * 1024 * 1024,            # safe on v5e/v6e/v7x
        ),
        cost_estimate=cost,
    )(x, w1, b1, w2, b2)

    # Only the lane padding of the output needs slicing off (no batch pad).
    return out[:, :L2]


def netG_images_forward(x, fp, *, tb=4096):
    """x: (B, L1) float32.  fp: output of prepare_params."""
    assert x.shape[1] == fp["L1"]
    return _forward_impl(
        x, fp["w1"], fp["b1"], fp["w2"], fp["b2"],
        L1=fp["L1"], L2=fp["L2"], smooth_output=fp["smooth_output"], tb=tb)


# ------------------------------ reference (checks) --------------------------- #

def _reference_forward(x, params, smooth_output):
    h = jnp.maximum(x @ params["w1"].T + params["b1"], 0.0)
    out = h @ params["w2"].T + params["b2"]
    if smooth_output:
        L2 = out.shape[1]
        s = int(math.isqrt(L2))
        img = out.reshape(-1, 1, s, s)
        conv = jax.lax.conv_general_dilated(
            img, params["sml_w"][None, None, :, :],
            window_strides=(1, 1), padding=((2, 2), (2, 2)))
        conv = conv + params["sml_b"][0]
        out = jax.nn.softplus(conv).reshape(-1, L2)
    return out


def init_params(key, L1, L2, K, smooth_output):
    """Deterministic uniform(-0.1, 0.1) init, mirroring initializationhelper."""
    c = 0.1
    keys = jax.random.split(key, 6)
    u = lambda k, shape: jax.random.uniform(k, shape, jnp.float32, -c, c)
    params = {
        "w1": u(keys[0], (K, L1)),   # torch Linear weight layout (out, in)
        "b1": u(keys[1], (K,)),
        "w2": u(keys[2], (L2, K)),
        "b2": u(keys[3], (L2,)),
    }
    if smooth_output:
        params["sml_w"] = u(keys[4], (5, 5))   # Conv2d(1,1,5) weight squeezed
        params["sml_b"] = u(keys[5], (1,))
    return params


# ----------------------------------- main ----------------------------------- #

if __name__ == "__main__":
    # Small shapes consistent with the module: L2 must be a perfect square.
    B, L1, K, L2 = 8, 32, 16, 64
    smooth_output = True

    key = jax.random.PRNGKey(0)
    k_inp, k_par = jax.random.split(key)
    x = jax.random.normal(k_inp, (B, L1), dtype=jnp.float32)
    params = init_params(k_par, L1, L2, K, smooth_output)

    fp = prepare_params(params, L1, L2, K, smooth_output)
    out = netG_images_forward(x, fp)
    jax.block_until_ready(out)
    assert out.shape == (B, L2), out.shape

    ref = _reference_forward(x, params, smooth_output)
    assert jnp.allclose(out, ref, atol=1e-3, rtol=1e-3), float(
        jnp.max(jnp.abs(out - ref)))

    # Also exercise a partial-last-block (masked) batch to validate the
    # no-batch-padding path.
    B2 = 20  # not a multiple of the sublane-aligned tile
    x2 = jax.random.normal(jax.random.PRNGKey(1), (B2, L1), dtype=jnp.float32)
    out2 = netG_images_forward(x2, fp)
    jax.block_until_ready(out2)
    ref2 = _reference_forward(x2, params, smooth_output)
    assert jnp.allclose(out2, ref2, atol=1e-3, rtol=1e-3), float(
        jnp.max(jnp.abs(out2 - ref2)))

    print("KERNEL_OK")
</pallas_src>

<mosaic_0001>
module attributes {stable_mosaic.version = 11 : i64} {
  func.func @_netg_kernel(%arg0: i32, %arg1: memref<8x32xf32, #tpu.memory_space<vmem>>, %arg2: memref<32x128xf32, #tpu.memory_space<vmem>>, %arg3: memref<1x128xf32, #tpu.memory_space<vmem>>, %arg4: memref<128x128xf32, #tpu.memory_space<vmem>>, %arg5: memref<1x128xf32, #tpu.memory_space<vmem>>, %arg6: memref<8x128xf32, #tpu.memory_space<vmem>>) attributes {dimension_semantics = [#tpu.dimension_semantics<parallel>], iteration_bounds = array<i64: 1>, scalar_prefetch = 0 : i64, scratch_operands = 0 : i64, tpu.core_type = #tpu.core_type<tc>, window_params = [{transform_indices = @transform_0, window_bounds = array<i64: 8, 32>}, {pipeline_mode = #tpu.pipeline_mode<synchronous>, transform_indices = @transform_1, window_bounds = array<i64: 32, 128>}, {pipeline_mode = #tpu.pipeline_mode<synchronous>, transform_indices = @transform_2, window_bounds = array<i64: 1, 128>}, {pipeline_mode = #tpu.pipeline_mode<synchronous>, transform_indices = @transform_3, window_bounds = array<i64: 128, 128>}, {pipeline_mode = #tpu.pipeline_mode<synchronous>, transform_indices = @transform_4, window_bounds = array<i64: 1, 128>}, {transform_indices = @transform_5, window_bounds = array<i64: 8, 128>}]} {
    %c0 = arith.constant 0 : index
    %c0_0 = arith.constant 0 : index
    %0 = vector.load %arg1[%c0, %c0_0] : memref<8x32xf32, #tpu.memory_space<vmem>>, vector<8x32xf32>
    %c0_1 = arith.constant 0 : index
    %c0_2 = arith.constant 0 : index
    %1 = vector.load %arg2[%c0_1, %c0_2] : memref<32x128xf32, #tpu.memory_space<vmem>>, vector<32x128xf32>
    %cst = arith.constant dense<0.000000e+00> : vector<8x128xf32>
    %2 = tpu.matmul %0, %1, %cst {dimension_numbers = #tpu.dot_dimension_numbers<[1], [0], [0], [1], [0, 0, 1, 1], [], []>} : vector<8x32xf32>, vector<32x128xf32>, vector<8x128xf32> -> vector<8x128xf32>
    %c0_3 = arith.constant 0 : index
    %c0_4 = arith.constant 0 : index
    %3 = vector.load %arg3[%c0_3, %c0_4] : memref<1x128xf32, #tpu.memory_space<vmem>>, vector<1x128xf32>
    %4 = vector.broadcast %3 : vector<1x128xf32> to vector<8x128xf32>
    %5 = arith.addf %2, %4 : vector<8x128xf32>
    %cst_5 = arith.constant 0.000000e+00 : f32
    %6 = vector.broadcast %cst_5 : f32 to vector<8x128xf32>
    %7 = arith.maximumf %5, %6 : vector<8x128xf32>
    %c0_6 = arith.constant 0 : index
    %c0_7 = arith.constant 0 : index
    %8 = vector.load %arg4[%c0_6, %c0_7] : memref<128x128xf32, #tpu.memory_space<vmem>>, vector<128x128xf32>
    %cst_8 = arith.constant dense<0.000000e+00> : vector<8x128xf32>
    %9 = tpu.matmul %7, %8, %cst_8 {dimension_numbers = #tpu.dot_dimension_numbers<[1], [0], [0], [1], [0, 0, 1, 1], [], []>} : vector<8x128xf32>, vector<128x128xf32>, vector<8x128xf32> -> vector<8x128xf32>
    %c0_9 = arith.constant 0 : index
    %c0_10 = arith.constant 0 : index
    %10 = vector.load %arg5[%c0_9, %c0_10] : memref<1x128xf32, #tpu.memory_space<vmem>>, vector<1x128xf32>
    %11 = vector.broadcast %10 : vector<1x128xf32> to vector<8x128xf32>
    %12 = arith.addf %9, %11 : vector<8x128xf32>
    %cst_11 = arith.constant 2.000000e+01 : f32
    %13 = vector.broadcast %cst_11 : f32 to vector<8x128xf32>
    %14 = arith.cmpf ogt, %12, %13 : vector<8x128xf32>
    %cst_12 = arith.constant 2.000000e+01 : f32
    %15 = vector.broadcast %cst_12 : f32 to vector<8x128xf32>
    %16 = arith.minimumf %12, %15 : vector<8x128xf32>
    %17 = math.exp %16 : vector<8x128xf32>
    %18 = math.log1p %17 : vector<8x128xf32>
    %19 = arith.select %14, %12, %18 : vector<8x128xi1>, vector<8x128xf32>
    %c0_13 = arith.constant 0 : index
    %c0_14 = arith.constant 0 : index
    %20 = vector.load %arg6[%c0_13, %c0_14] : memref<8x128xf32, #tpu.memory_space<vmem>>, vector<8x128xf32>
    tpu.vector_store %arg6[%c0_13, %c0_14], %19 {strides = array<i32>} : memref<8x128xf32, #tpu.memory_space<vmem>>, vector<8x128xf32>,
    return
  }
  func.func @transform_0(%arg0: i32) -> (i32, i32) {
    %c0_i32 = arith.constant 0 : i32
    %c0_i32_0 = arith.constant 0 : i32
    return %arg0, %c0_i32 : i32, i32
  }
  func.func @transform_1(%arg0: i32) -> (i32, i32) {
    %c0_i32 = arith.constant 0 : i32
    %c0_i32_0 = arith.constant 0 : i32
    %c0_i32_1 = arith.constant 0 : i32
    return %c0_i32, %c0_i32_0 : i32, i32
  }
  func.func @transform_2(%arg0: i32) -> (i32, i32) {
    %c0_i32 = arith.constant 0 : i32
    %c0_i32_0 = arith.constant 0 : i32
    %c0_i32_1 = arith.constant 0 : i32
    return %c0_i32, %c0_i32_0 : i32, i32
  }
  func.func @transform_3(%arg0: i32) -> (i32, i32) {
    %c0_i32 = arith.constant 0 : i32
    %c0_i32_0 = arith.constant 0 : i32
    %c0_i32_1 = arith.constant 0 : i32
    return %c0_i32, %c0_i32_0 : i32, i32
  }
  func.func @transform_4(%arg0: i32) -> (i32, i32) {
    %c0_i32 = arith.constant 0 : i32
    %c0_i32_0 = arith.constant 0 : i32
    %c0_i32_1 = arith.constant 0 : i32
    return %c0_i32, %c0_i32_0 : i32, i32
  }
  func.func @transform_5(%arg0: i32) -> (i32, i32) {
    %c0_i32 = arith.constant 0 : i32
    %c0_i32_0 = arith.constant 0 : i32
    return %arg0, %c0_i32 : i32, i32
  }
}

</mosaic_0001>

<bundles_post_ra>
// kernel: _forward_impl.1
= control target key start
LH: loop header
LB: loop body
LE: loop exit
PB: predicated region body
PF: predicated region fallthrough
CT: control target
= control target key end

     0   :  { %10 = vsyncpa [#allocation3], 0  ;;  %s578_s0 = inlined_call_operand.hbm [shape: f32[8,32], index: 0, kind: input, shape index: {}]   ;;  %s579_s1 = inlined_call_operand.hbm [shape: f32[32,128], index: 1, kind: input, shape index: {}]   ;;  %s580_s2 = inlined_call_operand.vmem [shape: f32[1,128], index: 2, kind: input, shape index: {}]   ;;  %s581_s3 = inlined_call_operand.hbm [shape: f32[128,128], index: 3, kind: input, shape index: {}]   ;;  %s582_s4 = inlined_call_operand.vmem [shape: f32[1,128], index: 4, kind: input, shape index: {}]   ;;  %s583_s5 = inlined_call_operand.hbm [shape: f32[8,128], index: 5, kind: output, shape index: {}]  }
   0x1   :  { %11 = vsyncpa [#allocation6], 0 }
   0x2   :  { %12 = vsyncpa [#allocation4], 0  ;;  %s479_s18 = smov [#allocation5]   ;;  %s385_s22 = scalar_lea.hbm %s579_s1, 512 }
   0x3   :  { %s28_s19 = sshll.u32 %s479_s18, 4  ;;  %p386_p0 = scmp.ne.s32.totalorder %s579_s1, %s385_s22  ;;  %s29_s19 = int_to_ptr.vmem [resolvable:$true] %s28_s19 }
   0x4   :  { %p389_p1 = scmp.lt.u32.totalorder %s385_s22, %s579_s1 }
   0x6   :  { %p391_p2 = pnand %p389_p1, %p386_p0 }
   0x8   :  { %394 = shalt.err (!%p391_p2)
}
   0x9   :  { %s395_s27 = scalar_lea.vmem %s29_s19, 512  ;;  %p400_p4 = scmp.lt.s32.totalorder %s29_s19, %s29_s19 }
   0xa   :  { %p396_p3 = scmp.ne.s32.totalorder %s29_s19, %s395_s27  ;;  %p401_p5 = scmp.lt.s32.totalorder %s395_s27, %s395_s27 }
   0xc   :  { %p402_p6 = por %p401_p5, %p400_p4 }
   0xe   :  { %p403_p7 = pnand %p402_p6, %p396_p3 }
  0x10   :  { %406 = shalt.err (!%p403_p7)
}
  0x11   :  { %s480_s28 = smov 128   ;;  %s481_s29 = smov 8  }
  0x12   :  { %34 = dma.hbm_to_vmem [thread:$0]  %s579_s1, 512, %s29_s19, [#allocation6], %s480_s28, %s480_s28, %s481_s29  }
  0x13   :  { %s482_s7 = smov [#allocation2]   ;;  %s483_s9 = smov [#allocation7]  }
  0x14   :  { %s19_s8 = sshll.u32 %s482_s7, 4  ;;  %s42_s10 = sshll.u32 %s483_s9, 4  ;;  %s20_s8 = int_to_ptr.vmem [resolvable:$true] %s19_s8  ;;  %s43_s10 = int_to_ptr.vmem [resolvable:$true] %s42_s10 }
  0x15   :  { %s407_s13 = scalar_lea.hbm %s578_s0, 128 }
  0x16   :  { %p408_p8 = scmp.ne.s32.totalorder %s578_s0, %s407_s13  ;;  %p411_p9 = scmp.lt.u32.totalorder %s407_s13, %s578_s0 }
  0x18   :  { %p413_p10 = pnand %p411_p9, %p408_p8 }
  0x1a   :  { %416 = shalt.err (!%p413_p10)
}
  0x1b   :  { %s417_s1 = scalar_lea.vmem %s20_s8, 128  ;;  %p422_p12 = scmp.lt.s32.totalorder %s20_s8, %s20_s8 }
  0x1c   :  { %p418_p11 = scmp.ne.s32.totalorder %s20_s8, %s417_s1  ;;  %p423_p13 = scmp.lt.s32.totalorder %s417_s1, %s417_s1 }
  0x1e   :  { %p424_p0 = por %p423_p13, %p422_p12 }
  0x20   :  { %p425_p1 = pnand %p424_p0, %p418_p11 }
  0x22   :  { %428 = shalt.err (!%p425_p1)
}
  0x23   :  { %22 = dma.hbm_to_vmem [thread:$0]  %s578_s0, 128, %s20_s8, [#allocation3]  }
  0x24   :  { %s429_s22 = scalar_lea.hbm %s581_s3, 2048 }
  0x25   :  { %p430_p2 = scmp.ne.s32.totalorder %s581_s3, %s429_s22  ;;  %p433_p3 = scmp.lt.u32.totalorder %s429_s22, %s581_s3 }
  0x27   :  { %p435_p4 = pnand %p433_p3, %p430_p2 }
  0x29   :  { %438 = shalt.err (!%p435_p4)
}
  0x2a   :  { %s439_s27 = scalar_lea.vmem %s43_s10, 2048  ;;  %p444_p6 = scmp.lt.s32.totalorder %s43_s10, %s43_s10 }
  0x2b   :  { %p440_p5 = scmp.ne.s32.totalorder %s43_s10, %s439_s27  ;;  %p445_p7 = scmp.lt.s32.totalorder %s439_s27, %s439_s27 }
  0x2d   :  { %p446_p8 = por %p445_p7, %p444_p6 }
  0x2f   :  { %p447_p9 = pnand %p446_p8, %p440_p5 }
  0x31   :  { %450 = shalt.err (!%p447_p9)
}
  0x32   :  { %48 = dma.hbm_to_vmem [thread:$0]  %s581_s3, 2048, %s43_s10, [#allocation6], %s480_s28, %s480_s28, %s481_s29  }
  0x33   :  { %473 = dma.done.wait [#allocation3], 128  }
  0x34   :  { %474 = vsyncadd [#allocation3], 4294967168 }
  0x35   :  { %475 = dma.done.wait [#allocation6], 2560  }
  0x36   :  { %476 = vsyncadd [#allocation6], 4294964736  ;;  %v484_v0 = vmov 0.0|0.0   ;;  %vm485_vm0 = vmmov 0   ;;  %v486_v1 = vmov 0.0   ;;  %v61_v2 = vld [vmem:[#allocation5] sm:$0xff] }
  0x37   :  { %342 = vmatprep.subr.bf16.mxu0 %v484_v0  ;;  %304 = vmatprep.mubr.msk.f32.mxu0 %vm485_vm0, %v486_v1  ;;  %v62_v3 = vld [vmem:[#allocation5 + $0x8] sm:$0xff]  ;;  %v63_v4 = vld [vmem:[#allocation5 + $0x10] sm:$0xff]  ;;  %v64_v6 = vld [vmem:[#allocation5 + $0x18] sm:$0xff]  ;;  %vm72_vm1 = vcmask 261120  }
  0x38   :  { %348 = vmatprep.subr.bf16.mxu1 %v484_v0  ;;  %339 = vmatprep.mubr.msk.f32.mxu1 %vm485_vm0, %v486_v1  ;;  %v343_v5 = vpack.c.bf16 %v62_v3, %v61_v2  ;;  %v147_v7 = vld [vmem:[#allocation7] sm:$0xff]  ;;  %v148_v8 = vld [vmem:[#allocation7 + $0x8] sm:$0xff]  ;;  %v149_v9 = vld [vmem:[#allocation7 + $0x10] sm:$0xff]  ;;  %v346_v11 = vpack.c.bf16 %v64_v6, %v63_v4 }
  0x39   :  { %v150_v10 = vld [vmem:[#allocation7 + $0x18] sm:$0xff]  ;;  %v349_v12 = vpack.c.bf16 %v148_v8, %v147_v7  ;;  %v151_v14 = vld [vmem:[#allocation7 + $0x20] sm:$0xff]  ;;  %v152_v15 = vld [vmem:[#allocation7 + $0x28] sm:$0xff] }
  0x3a   :  { %344 = vmatpush3.bf16.msra.mxu0 %v343_v5  ;;  %v352_v13 = vpack.c.bf16 %v150_v10, %v149_v9  ;;  %v60_v16 = vld [vmem:[#allocation2] sm:$0xff]  ;;  %v355_v17 = vpack.c.bf16 %v152_v15, %v151_v14  ;;  %v153_v18 = vld [vmem:[#allocation7 + $0x30] sm:$0xff]  ;;  %v155_v21 = vld [vmem:[#allocation7 + $0x40] sm:$0xff] }
  0x3b   :  { %345 = vmatprep.subr.bf16.mxu0 %v484_v0  ;;  %350 = vmatpush3.bf16.msra.mxu1 %v349_v12  ;;  %v154_v19 = vld [vmem:[#allocation7 + $0x38] sm:$0xff]  ;;  %v156_v22 = vld [vmem:[#allocation7 + $0x48] sm:$0xff]  ;;  %v157_v24 = vld [vmem:[#allocation7 + $0x50] sm:$0xff] }
  0x3c   :  { %351 = vmatprep.subr.bf16.mxu1 %v484_v0  ;;  %v358_v20 = vpack.c.bf16 %v154_v19, %v153_v18  ;;  %v361_v23 = vpack.c.bf16 %v156_v22, %v155_v21  ;;  %v158_v25 = vld [vmem:[#allocation7 + $0x58] sm:$0xff]  ;;  %v159_v27 = vld [vmem:[#allocation7 + $0x60] sm:$0xff]  ;;  %v160_v28 = vld [vmem:[#allocation7 + $0x68] sm:$0xff] }
  0x3d   :  { %v364_v26 = vpack.c.bf16 %v158_v25, %v157_v24  ;;  %v367_v29 = vpack.c.bf16 %v160_v28, %v159_v27  ;;  %v161_v30 = vld [vmem:[#allocation7 + $0x70] sm:$0xff]  ;;  %v162_v31 = vld [vmem:[#allocation7 + $0x78] sm:$0xff] }
  0x3e   :  { %347 = vmatpush3.bf16.msra.mxu0 %v346_v11  ;;  %v370_v32 = vpack.c.bf16 %v162_v31, %v161_v30  ;;  %v271_v33 = vld [vmem:[%s580_s2] ss:$0 sm:$0xff]  ;;  %s487_s2 = smov [#allocation8]  }
  0x3f   :  { %353 = vmatpush3.bf16.msra.mxu1 %v352_v13  ;;  %v273_v38 = vld [vmem:[%s582_s4] ss:$0 sm:$0xff]  ;;  %s261_s7 = sshll.u32 %s487_s2, 4  ;;  %s262_s7 = int_to_ptr.vmem [resolvable:$true] %s261_s7 }
  0x40   :  { %354 = vmatprep.subr.bf16.mxu1 %v484_v0  ;;  %s451_s4 = scalar_lea.vmem %s262_s7, 128  ;;  %p456_p11 = scmp.lt.s32.totalorder %s262_s7, %s262_s7 }
  0x41   :  { %305 = vmatmul.mubr.msk.f32.vlgmr.msra.gmra.mrb[0].mxu0 %vm72_vm1, %v60_v16  ;;  %p452_p10 = scmp.ne.s32.totalorder %s262_s7, %s451_s4  ;;  %p457_p12 = scmp.lt.s32.totalorder %s451_s4, %s451_s4 }
  0x43   :  { %356 = vmatpush3.bf16.msra.mxu1 %v355_v17  ;;  %p458_p13 = por %p457_p12, %p456_p11 }
  0x44   :  { %357 = vmatprep.subr.bf16.mxu1 %v484_v0 }
  0x45   :  { %p459_p0 = pnand %p458_p13, %p452_p10 }
  0x47   :  { %359 = vmatpush3.bf16.msra.mxu1 %v358_v20 }
  0x48   :  { %360 = vmatprep.subr.bf16.mxu1 %v484_v0 }
  0x4b   :  { %362 = vmatpush3.bf16.msra.mxu1 %v361_v23 }
  0x4c   :  { %363 = vmatprep.subr.bf16.mxu1 %v484_v0 }
  0x4f   :  { %365 = vmatpush3.bf16.msra.mxu1 %v364_v26 }
  0x50   :  { %366 = vmatprep.subr.bf16.mxu1 %v484_v0 }
  0x53   :  { %368 = vmatpush3.bf16.msra.mxu1 %v367_v29 }
  0x54   :  { %369 = vmatprep.subr.bf16.mxu1 %v484_v0 }
  0x57   :  { %371 = vmatpush3.bf16.msra.mxu1 %v370_v32 }
 0x114   :  { %v142_v34 = vpop.f32.mrb[0].mxu0 }
 0x115   :  { %v143_v35 = vadd.f32 %v271_v33, %v142_v34  ;;  %v306_v36 = vpop.f32.mrb[1].mxu0 }
 0x117   :  { %v146_v37 = vmax.f32 %v143_v35, 0.0 }
 0x119   :  { %340 = vmatmul.mubr.f32.vlgmr.msra.gmra.mrb[0].mxu1 %v146_v37 }
 0x1ec   :  { %v236_v39 = vpop.f32.mrb[0].mxu1 }
 0x1ed   :  { %v237_v40 = vadd.f32 %v273_v38, %v236_v39  ;;  %v341_v41 = vpop.f32.mrb[1].mxu1 }
 0x1ef   :  { %v241_v42 = vmin.f32 %v237_v40, 20.0  ;;  %vm240_vm3 = vcmp.gt.f32.partialorder %v237_v40, 20.0 }
 0x1f1   :  { %v242_v43 = vmul.f32 1.442695, %v241_v42 }
 0x1f3   :  { %381 = vpow2.f32 %v242_v43 }
 0x1fd   :  { %v382_v44 = vpop.eup %381 }
 0x1fe   :  { %v244_v45 = vadd.f32 1.0, %v382_v44  ;;  %v247_v46 = vmul.f32 -0.5, %v382_v44  ;;  %v250_v48 = vand.u32 2147483647, %v382_v44 }
 0x200   :  { %383 = vlog2.f32 %v244_v45  ;;  %v248_v47 = vadd.f32 1.0, %v247_v46  ;;  %vm251_vm2 = vcmp.lt.f32.partialorder %v250_v48, 0.0004427343 }
 0x202   :  { %v249_v51 = vmul.f32 %v382_v44, %v248_v47 }
 0x20a   :  { %v384_v49 = vpop.eup %383 }
 0x20b   :  { %v246_v50 = vmul.f32 0.6931472, %v384_v49 }
 0x20d   :  { %v252_v52 = vsel %vm251_vm2, %v249_v51, %v246_v50 }
 0x20e   :  { %v253_v53 = vsel %vm240_vm3, %v237_v40, %v252_v52 }
 0x20f   :  { %254 = vst [vmem:[#allocation8] sm:$0xff] %v253_v53 }
 0x210   :  { %462 = shalt.err (!%p459_p0)
}
 0x211   :  { %s463_s10 = scalar_lea.hbm %s583_s5, 128 }
 0x212   :  { %p464_p1 = scmp.ne.s32.totalorder %s583_s5, %s463_s10  ;;  %p467_p2 = scmp.lt.u32.totalorder %s463_s10, %s583_s5 }
 0x214   :  { %p469_p3 = pnand %p467_p2, %p464_p1 }
 0x216   :  { %472 = shalt.err (!%p469_p3)
}
 0x217   :  { %264 = dma.vmem_to_hbm [thread:$0]  %s262_s7, 128, %s583_s5, [#allocation4]  }
 0x218   :  { %477 = dma.done.wait [#allocation4], 128  }
 0x219   :  { %478 = vsyncadd [#allocation4], 4294967168 }
 0x21a   :  { %268 = vsyncpa [#allocation3], 1 }
 0x21b   :  { %269 = vsyncpa [#allocation6], 1 }
 0x21c   :  { %270 = vsyncpa [#allocation4], 1 }

</bundles_post_ra>
